<compile_context>
chip_gen: v7x
topology: tpu7x:2x2x1
jax: 0.10.0
libtpu: 0.0.40
codegen_flags: <defaults>
</compile_context>

<pallas_src>
import jax
import jax.numpy as jnp
from jax.experimental import pallas as pl
from jax.experimental.pallas import tpu as pltpu


def _sam_kernel(x_ref, i_ref, w_ref, b_ref, restored_ref, out_ref):
    # x_ref / i_ref / outputs: (1, C, T) blocks; T spatial positions in lanes.
    # w_ref: (3, C_out, C_in) stacked conv weights.  b_ref: (3, C_out, 1).
    x = x_ref[0].astype(jnp.float32)    # (C, T)
    ii = i_ref[0].astype(jnp.float32)   # (C, T)
    C = x.shape[0]

    def conv1x1(src, layer):
        # out[co, t] = b[co] + sum_ci w[co, ci] * src[ci, t]   (VPU broadcast FMAs)
        w = w_ref[layer]                      # (C, C), tiny and VMEM-resident
        acc = w[:, 0:1] * src[0:1, :]         # (C,1) * (1,T) -> (C,T)
        for ci in range(1, C):
            acc = acc + w[:, ci:ci + 1] * src[ci:ci + 1, :]
        return acc + b_ref[layer]             # + (C,1), lane-broadcast

    restored = conv1x1(x, 0) + ii
    att = jax.nn.sigmoid(conv1x1(restored, 1))
    f_in = conv1x1(x, 2)

    restored_ref[0] = restored.astype(restored_ref.dtype)
    out_ref[0] = (att * f_in + ii).astype(out_ref.dtype)


def sam_forward(x_nchw, i_nchw, params, *, target_block_bytes=1 << 19):
    """SAM forward.  x_nchw, i_nchw: (N, C, H, W) float32."""
    N, C, H, W = x_nchw.shape
    HW = H * W

    # Free reshapes (no data movement): (N,C,H,W) -> (N,C,H*W).
    x_flat = x_nchw.reshape(N, C, HW)
    i_flat = i_nchw.reshape(N, C, HW)

    w1, b1, w2, b2, w3, b3 = params                      # w*: (C_out,C_in), b*: (C_out,)
    w_stack = jnp.stack([w1, w2, w3]).astype(jnp.float32)            # (3, C, C)
    b_stack = jnp.stack([b1, b2, b3]).astype(jnp.float32)[..., None]  # (3, C, 1)

    # Spatial tile: lane-dense, ~target_block_bytes per streamed block.
    itemsize = jnp.dtype(x_flat.dtype).itemsize
    max_lanes = max(128, (target_block_bytes // (C * itemsize)) // 128 * 128)
    hw_tile = HW if HW <= max_lanes else max_lanes
    n_hw = pl.cdiv(HW, hw_tile)                           # tail tile masked by Pallas

    act_spec = pl.BlockSpec((1, C, hw_tile), lambda n, j: (n, 0, j))
    w_spec = pl.BlockSpec((3, C, C), lambda n, j: (0, 0, 0))
    b_spec = pl.BlockSpec((3, C, 1), lambda n, j: (0, 0, 0))

    restored, out = pl.pallas_call(
        _sam_kernel,
        out_shape=(jax.ShapeDtypeStruct((N, C, HW), x_flat.dtype),
                   jax.ShapeDtypeStruct((N, C, HW), x_flat.dtype)),
        grid_spec=pltpu.PrefetchScalarGridSpec(
            num_scalar_prefetch=0,
            grid=(N, n_hw),
            in_specs=[act_spec, act_spec, w_spec, b_spec],
            out_specs=[act_spec, act_spec],
        ),
        compiler_params=pltpu.CompilerParams(
            dimension_semantics=("parallel", "parallel")),
    )(x_flat, i_flat, w_stack, b_stack)

    return restored.reshape(N, C, H, W), out.reshape(N, C, H, W)


def init_params(key, num_channels, input_channels):
    """Deterministic init of the three 1x1 conv layers (weight (out,in), bias (out,))."""
    ks = jax.random.split(key, 6)

    def conv(kw, kb, c_out, c_in):
        # mimic PyTorch default uniform(-1/sqrt(fan_in), 1/sqrt(fan_in))
        bound = 1.0 / jnp.sqrt(jnp.float32(c_in))
        w = jax.random.uniform(kw, (c_out, c_in), jnp.float32, -bound, bound)
        b = jax.random.uniform(kb, (c_out,), jnp.float32, -bound, bound)
        return w, b

    w1, b1 = conv(ks[0], ks[1], input_channels, num_channels)
    w2, b2 = conv(ks[2], ks[3], input_channels, num_channels)
    w3, b3 = conv(ks[4], ks[5], input_channels, num_channels)
    return (w1, b1, w2, b2, w3, b3)


def sam_reference(x, i, params):
    """Pure-JAX reference (NCHW) matching the PyTorch module."""
    w1, b1, w2, b2, w3, b3 = params

    def conv1x1(a, w, b):
        return jnp.einsum('nchw,oc->nohw', a, w) + b[None, :, None, None]

    restored = conv1x1(x, w1, b1) + i
    att = jax.nn.sigmoid(conv1x1(restored, w2, b2))
    f_in = conv1x1(x, w3, b3)
    return restored, att * f_in + i


if __name__ == "__main__":
    key = jax.random.PRNGKey(0)
    k_x, k_i, k_p = jax.random.split(key, 3)

    N, C, H, W = 2, 4, 16, 16          # num_channels == input_channels == 4
    x = jax.random.normal(k_x, (N, C, H, W), jnp.float32)
    i = jax.random.normal(k_i, (N, C, H, W), jnp.float32)
    params = init_params(k_p, num_channels=C, input_channels=C)

    restored, out = sam_forward(x, i, params)
    jax.block_until_ready((restored, out))

    restored_ref, out_ref = sam_reference(x, i, params)
    assert jnp.allclose(restored, restored_ref, atol=1e-5, rtol=1e-5)
    assert jnp.allclose(out, out_ref, atol=1e-5, rtol=1e-5)

    print("KERNEL_OK")
</pallas_src>

<mosaic_0001>
module attributes {stable_mosaic.version = 11 : i64} {
  func.func @_sam_kernel(%arg0: i32, %arg1: i32, %arg2: memref<1x4x256xf32, #tpu.memory_space<vmem>>, %arg3: memref<1x4x256xf32, #tpu.memory_space<vmem>>, %arg4: memref<3x4x4xf32, #tpu.memory_space<vmem>>, %arg5: memref<3x4x1xf32, #tpu.memory_space<vmem>>, %arg6: memref<1x4x256xf32, #tpu.memory_space<vmem>>, %arg7: memref<1x4x256xf32, #tpu.memory_space<vmem>>) attributes {dimension_semantics = [#tpu.dimension_semantics<parallel>, #tpu.dimension_semantics<parallel>], iteration_bounds = array<i64: 2, 1>, scalar_prefetch = 0 : i64, scratch_operands = 0 : i64, tpu.core_type = #tpu.core_type<tc>, window_params = [{transform_indices = @transform_0, window_bounds = array<i64: 1, 4, 256>}, {transform_indices = @transform_1, window_bounds = array<i64: 1, 4, 256>}, {pipeline_mode = #tpu.pipeline_mode<synchronous>, transform_indices = @transform_2, window_bounds = array<i64: 3, 4, 4>}, {pipeline_mode = #tpu.pipeline_mode<synchronous>, transform_indices = @transform_3, window_bounds = array<i64: 3, 4, 1>}, {transform_indices = @transform_4, window_bounds = array<i64: 1, 4, 256>}, {transform_indices = @transform_5, window_bounds = array<i64: 1, 4, 256>}]} {
    %c0 = arith.constant 0 : index
    %c0_0 = arith.constant 0 : index
    %c0_1 = arith.constant 0 : index
    %0 = vector.load %arg2[%c0, %c0_0, %c0_1] : memref<1x4x256xf32, #tpu.memory_space<vmem>>, vector<1x4x256xf32>
    %1 = vector.shape_cast %0 : vector<1x4x256xf32> to vector<4x256xf32>
    %c0_2 = arith.constant 0 : index
    %c0_3 = arith.constant 0 : index
    %c0_4 = arith.constant 0 : index
    %2 = vector.load %arg3[%c0_2, %c0_3, %c0_4] : memref<1x4x256xf32, #tpu.memory_space<vmem>>, vector<1x4x256xf32>
    %3 = vector.shape_cast %2 : vector<1x4x256xf32> to vector<4x256xf32>
    %c0_5 = arith.constant 0 : index
    %c0_6 = arith.constant 0 : index
    %c0_7 = arith.constant 0 : index
    %4 = vector.load %arg4[%c0_5, %c0_6, %c0_7] : memref<3x4x4xf32, #tpu.memory_space<vmem>>, vector<1x4x4xf32>
    %5 = vector.shape_cast %4 : vector<1x4x4xf32> to vector<4x4xf32>
    %6 = vector.extract_strided_slice %5 {offsets = [0, 0], sizes = [4, 1], strides = [1, 1]} : vector<4x4xf32> to vector<4x1xf32>
    %7 = vector.extract_strided_slice %1 {offsets = [0, 0], sizes = [1, 256], strides = [1, 1]} : vector<4x256xf32> to vector<1x256xf32>
    %8 = vector.broadcast %6 : vector<4x1xf32> to vector<4x256xf32>
    %9 = vector.broadcast %7 : vector<1x256xf32> to vector<4x256xf32>
    %10 = arith.mulf %8, %9 : vector<4x256xf32>
    %11 = vector.extract_strided_slice %5 {offsets = [0, 1], sizes = [4, 1], strides = [1, 1]} : vector<4x4xf32> to vector<4x1xf32>
    %12 = vector.extract_strided_slice %1 {offsets = [1, 0], sizes = [1, 256], strides = [1, 1]} : vector<4x256xf32> to vector<1x256xf32>
    %13 = vector.broadcast %11 : vector<4x1xf32> to vector<4x256xf32>
    %14 = vector.broadcast %12 : vector<1x256xf32> to vector<4x256xf32>
    %15 = arith.mulf %13, %14 : vector<4x256xf32>
    %16 = arith.addf %10, %15 : vector<4x256xf32>
    %17 = vector.extract_strided_slice %5 {offsets = [0, 2], sizes = [4, 1], strides = [1, 1]} : vector<4x4xf32> to vector<4x1xf32>
    %18 = vector.extract_strided_slice %1 {offsets = [2, 0], sizes = [1, 256], strides = [1, 1]} : vector<4x256xf32> to vector<1x256xf32>
    %19 = vector.broadcast %17 : vector<4x1xf32> to vector<4x256xf32>
    %20 = vector.broadcast %18 : vector<1x256xf32> to vector<4x256xf32>
    %21 = arith.mulf %19, %20 : vector<4x256xf32>
    %22 = arith.addf %16, %21 : vector<4x256xf32>
    %23 = vector.extract_strided_slice %5 {offsets = [0, 3], sizes = [4, 1], strides = [1, 1]} : vector<4x4xf32> to vector<4x1xf32>
    %24 = vector.extract_strided_slice %1 {offsets = [3, 0], sizes = [1, 256], strides = [1, 1]} : vector<4x256xf32> to vector<1x256xf32>
    %25 = vector.broadcast %23 : vector<4x1xf32> to vector<4x256xf32>
    %26 = vector.broadcast %24 : vector<1x256xf32> to vector<4x256xf32>
    %27 = arith.mulf %25, %26 : vector<4x256xf32>
    %28 = arith.addf %22, %27 : vector<4x256xf32>
    %c0_8 = arith.constant 0 : index
    %c0_9 = arith.constant 0 : index
    %c0_10 = arith.constant 0 : index
    %29 = vector.load %arg5[%c0_8, %c0_9, %c0_10] : memref<3x4x1xf32, #tpu.memory_space<vmem>>, vector<1x4x1xf32>
    %30 = vector.shape_cast %29 : vector<1x4x1xf32> to vector<4x1xf32>
    %31 = vector.broadcast %30 : vector<4x1xf32> to vector<4x256xf32>
    %32 = arith.addf %28, %31 : vector<4x256xf32>
    %33 = arith.addf %32, %3 : vector<4x256xf32>
    %c1 = arith.constant 1 : index
    %c0_11 = arith.constant 0 : index
    %c0_12 = arith.constant 0 : index
    %34 = vector.load %arg4[%c1, %c0_11, %c0_12] : memref<3x4x4xf32, #tpu.memory_space<vmem>>, vector<1x4x4xf32>
    %35 = vector.shape_cast %34 : vector<1x4x4xf32> to vector<4x4xf32>
    %36 = vector.extract_strided_slice %35 {offsets = [0, 0], sizes = [4, 1], strides = [1, 1]} : vector<4x4xf32> to vector<4x1xf32>
    %37 = vector.extract_strided_slice %33 {offsets = [0, 0], sizes = [1, 256], strides = [1, 1]} : vector<4x256xf32> to vector<1x256xf32>
    %38 = vector.broadcast %36 : vector<4x1xf32> to vector<4x256xf32>
    %39 = vector.broadcast %37 : vector<1x256xf32> to vector<4x256xf32>
    %40 = arith.mulf %38, %39 : vector<4x256xf32>
    %41 = vector.extract_strided_slice %35 {offsets = [0, 1], sizes = [4, 1], strides = [1, 1]} : vector<4x4xf32> to vector<4x1xf32>
    %42 = vector.extract_strided_slice %33 {offsets = [1, 0], sizes = [1, 256], strides = [1, 1]} : vector<4x256xf32> to vector<1x256xf32>
    %43 = vector.broadcast %41 : vector<4x1xf32> to vector<4x256xf32>
    %44 = vector.broadcast %42 : vector<1x256xf32> to vector<4x256xf32>
    %45 = arith.mulf %43, %44 : vector<4x256xf32>
    %46 = arith.addf %40, %45 : vector<4x256xf32>
    %47 = vector.extract_strided_slice %35 {offsets = [0, 2], sizes = [4, 1], strides = [1, 1]} : vector<4x4xf32> to vector<4x1xf32>
    %48 = vector.extract_strided_slice %33 {offsets = [2, 0], sizes = [1, 256], strides = [1, 1]} : vector<4x256xf32> to vector<1x256xf32>
    %49 = vector.broadcast %47 : vector<4x1xf32> to vector<4x256xf32>
    %50 = vector.broadcast %48 : vector<1x256xf32> to vector<4x256xf32>
    %51 = arith.mulf %49, %50 : vector<4x256xf32>
    %52 = arith.addf %46, %51 : vector<4x256xf32>
    %53 = vector.extract_strided_slice %35 {offsets = [0, 3], sizes = [4, 1], strides = [1, 1]} : vector<4x4xf32> to vector<4x1xf32>
    %54 = vector.extract_strided_slice %33 {offsets = [3, 0], sizes = [1, 256], strides = [1, 1]} : vector<4x256xf32> to vector<1x256xf32>
    %55 = vector.broadcast %53 : vector<4x1xf32> to vector<4x256xf32>
    %56 = vector.broadcast %54 : vector<1x256xf32> to vector<4x256xf32>
    %57 = arith.mulf %55, %56 : vector<4x256xf32>
    %58 = arith.addf %52, %57 : vector<4x256xf32>
    %c1_13 = arith.constant 1 : index
    %c0_14 = arith.constant 0 : index
    %c0_15 = arith.constant 0 : index
    %59 = vector.load %arg5[%c1_13, %c0_14, %c0_15] : memref<3x4x1xf32, #tpu.memory_space<vmem>>, vector<1x4x1xf32>
    %60 = vector.shape_cast %59 : vector<1x4x1xf32> to vector<4x1xf32>
    %61 = vector.broadcast %60 : vector<4x1xf32> to vector<4x256xf32>
    %62 = arith.addf %58, %61 : vector<4x256xf32>
    %63 = arith.negf %62 : vector<4x256xf32>
    %64 = math.exp %63 : vector<4x256xf32>
    %cst = arith.constant 1.000000e+00 : f32
    %65 = vector.broadcast %cst : f32 to vector<4x256xf32>
    %66 = arith.addf %65, %64 : vector<4x256xf32>
    %67 = arith.divf %65, %66 : vector<4x256xf32>
    %c2 = arith.constant 2 : index
    %c0_16 = arith.constant 0 : index
    %c0_17 = arith.constant 0 : index
    %68 = vector.load %arg4[%c2, %c0_16, %c0_17] : memref<3x4x4xf32, #tpu.memory_space<vmem>>, vector<1x4x4xf32>
    %69 = vector.shape_cast %68 : vector<1x4x4xf32> to vector<4x4xf32>
    %70 = vector.extract_strided_slice %69 {offsets = [0, 0], sizes = [4, 1], strides = [1, 1]} : vector<4x4xf32> to vector<4x1xf32>
    %71 = vector.extract_strided_slice %1 {offsets = [0, 0], sizes = [1, 256], strides = [1, 1]} : vector<4x256xf32> to vector<1x256xf32>
    %72 = vector.broadcast %70 : vector<4x1xf32> to vector<4x256xf32>
    %73 = vector.broadcast %71 : vector<1x256xf32> to vector<4x256xf32>
    %74 = arith.mulf %72, %73 : vector<4x256xf32>
    %75 = vector.extract_strided_slice %69 {offsets = [0, 1], sizes = [4, 1], strides = [1, 1]} : vector<4x4xf32> to vector<4x1xf32>
    %76 = vector.extract_strided_slice %1 {offsets = [1, 0], sizes = [1, 256], strides = [1, 1]} : vector<4x256xf32> to vector<1x256xf32>
    %77 = vector.broadcast %75 : vector<4x1xf32> to vector<4x256xf32>
    %78 = vector.broadcast %76 : vector<1x256xf32> to vector<4x256xf32>
    %79 = arith.mulf %77, %78 : vector<4x256xf32>
    %80 = arith.addf %74, %79 : vector<4x256xf32>
    %81 = vector.extract_strided_slice %69 {offsets = [0, 2], sizes = [4, 1], strides = [1, 1]} : vector<4x4xf32> to vector<4x1xf32>
    %82 = vector.extract_strided_slice %1 {offsets = [2, 0], sizes = [1, 256], strides = [1, 1]} : vector<4x256xf32> to vector<1x256xf32>
    %83 = vector.broadcast %81 : vector<4x1xf32> to vector<4x256xf32>
    %84 = vector.broadcast %82 : vector<1x256xf32> to vector<4x256xf32>
    %85 = arith.mulf %83, %84 : vector<4x256xf32>
    %86 = arith.addf %80, %85 : vector<4x256xf32>
    %87 = vector.extract_strided_slice %69 {offsets = [0, 3], sizes = [4, 1], strides = [1, 1]} : vector<4x4xf32> to vector<4x1xf32>
    %88 = vector.extract_strided_slice %1 {offsets = [3, 0], sizes = [1, 256], strides = [1, 1]} : vector<4x256xf32> to vector<1x256xf32>
    %89 = vector.broadcast %87 : vector<4x1xf32> to vector<4x256xf32>
    %90 = vector.broadcast %88 : vector<1x256xf32> to vector<4x256xf32>
    %91 = arith.mulf %89, %90 : vector<4x256xf32>
    %92 = arith.addf %86, %91 : vector<4x256xf32>
    %c2_18 = arith.constant 2 : index
    %c0_19 = arith.constant 0 : index
    %c0_20 = arith.constant 0 : index
    %93 = vector.load %arg5[%c2_18, %c0_19, %c0_20] : memref<3x4x1xf32, #tpu.memory_space<vmem>>, vector<1x4x1xf32>
    %94 = vector.shape_cast %93 : vector<1x4x1xf32> to vector<4x1xf32>
    %95 = vector.broadcast %94 : vector<4x1xf32> to vector<4x256xf32>
    %96 = arith.addf %92, %95 : vector<4x256xf32>
    %c0_21 = arith.constant 0 : index
    %c0_22 = arith.constant 0 : index
    %c0_23 = arith.constant 0 : index
    %97 = vector.load %arg6[%c0_21, %c0_22, %c0_23] : memref<1x4x256xf32, #tpu.memory_space<vmem>>, vector<1x4x256xf32>
    %98 = vector.shape_cast %97 : vector<1x4x256xf32> to vector<4x256xf32>
    %99 = vector.shape_cast %33 : vector<4x256xf32> to vector<1x4x256xf32>
    tpu.vector_store %arg6[%c0_21, %c0_22, %c0_23], %99 {strides = array<i32>} : memref<1x4x256xf32, #tpu.memory_space<vmem>>, vector<1x4x256xf32>,
    %100 = arith.mulf %67, %96 : vector<4x256xf32>
    %101 = arith.addf %100, %3 : vector<4x256xf32>
    %c0_24 = arith.constant 0 : index
    %c0_25 = arith.constant 0 : index
    %c0_26 = arith.constant 0 : index
    %102 = vector.load %arg7[%c0_24, %c0_25, %c0_26] : memref<1x4x256xf32, #tpu.memory_space<vmem>>, vector<1x4x256xf32>
    %103 = vector.shape_cast %102 : vector<1x4x256xf32> to vector<4x256xf32>
    %104 = vector.shape_cast %101 : vector<4x256xf32> to vector<1x4x256xf32>
    tpu.vector_store %arg7[%c0_24, %c0_25, %c0_26], %104 {strides = array<i32>} : memref<1x4x256xf32, #tpu.memory_space<vmem>>, vector<1x4x256xf32>,
    return
  }
  func.func @transform_0(%arg0: i32, %arg1: i32) -> (i32, i32, i32) {
    %c0_i32 = arith.constant 0 : i32
    %c0_i32_0 = arith.constant 0 : i32
    return %arg0, %c0_i32, %arg1 : i32, i32, i32
  }
  func.func @transform_1(%arg0: i32, %arg1: i32) -> (i32, i32, i32) {
    %c0_i32 = arith.constant 0 : i32
    %c0_i32_0 = arith.constant 0 : i32
    return %arg0, %c0_i32, %arg1 : i32, i32, i32
  }
  func.func @transform_2(%arg0: i32, %arg1: i32) -> (i32, i32, i32) {
    %c0_i32 = arith.constant 0 : i32
    %c0_i32_0 = arith.constant 0 : i32
    %c0_i32_1 = arith.constant 0 : i32
    %c0_i32_2 = arith.constant 0 : i32
    return %c0_i32, %c0_i32_0, %c0_i32_1 : i32, i32, i32
  }
  func.func @transform_3(%arg0: i32, %arg1: i32) -> (i32, i32, i32) {
    %c0_i32 = arith.constant 0 : i32
    %c0_i32_0 = arith.constant 0 : i32
    %c0_i32_1 = arith.constant 0 : i32
    %c0_i32_2 = arith.constant 0 : i32
    return %c0_i32, %c0_i32_0, %c0_i32_1 : i32, i32, i32
  }
  func.func @transform_4(%arg0: i32, %arg1: i32) -> (i32, i32, i32) {
    %c0_i32 = arith.constant 0 : i32
    %c0_i32_0 = arith.constant 0 : i32
    return %arg0, %c0_i32, %arg1 : i32, i32, i32
  }
  func.func @transform_5(%arg0: i32, %arg1: i32) -> (i32, i32, i32) {
    %c0_i32 = arith.constant 0 : i32
    %c0_i32_0 = arith.constant 0 : i32
    return %arg0, %c0_i32, %arg1 : i32, i32, i32
  }
}

</mosaic_0001>

<bundles_post_ra>
// kernel: tpu_custom_call.1
= control target key start
LH: loop header
LB: loop body
LE: loop exit
PB: predicated region body
PF: predicated region fallthrough
CT: control target
= control target key end

     0   :  { %11 = vsyncpa [#allocation3], 0  ;;  %s1467_s0 = inlined_call_operand.hbm [shape: f32[2,4,256], index: 0, kind: input, shape index: {}]   ;;  %s1468_s1 = inlined_call_operand.vmem [shape: f32[2,4,256], index: 1, kind: input, shape index: {}]   ;;  %s1469_s2 = inlined_call_operand.hbm [shape: f32[3,4,4], index: 2, kind: input, shape index: {}]   ;;  %s1470_s3 = inlined_call_operand.vmem [shape: f32[3,4,1], index: 3, kind: input, shape index: {}]   ;;  %s1471_s4 = inlined_call_operand.hbm [shape: f32[2,4,256], index: 4, kind: output, shape index: {0}]   ;;  %s1472_s5 = inlined_call_operand.hbm [shape: f32[2,4,256], index: 5, kind: output, shape index: {1}]  }
   0x1   :  { %13 = vsyncpa [#allocation3 + $0x1], 0 }
   0x2   :  { %14 = vsyncpa [#allocation6], 0 }
   0x3   :  { %15 = vsyncpa [#allocation4], 0 }
   0x4   :  { %17 = vsyncpa [#allocation4 + $0x1], 0 }
   0x5   :  { %18 = vsyncpa [#allocation9], 0 }
   0x6   :  { %20 = vsyncpa [#allocation9 + $0x1], 0  ;;  %s1129_s18 = smov 0   ;;  %s1131_s19 = smov 0  }
   0x7   :  { %s1133_s20 = smov 0   ;;  %s1135_s21 = smov 0  }
   0x8   :  { %s1137_s22 = smov 0   ;;  %s1139_s23 = smov 0  }
   0x9 LB: > { %s773_s24 = sadd.s32 4294967295, %s1087_s23   ;;  %s774_s25 = sadd.s32 4294967294, %s1087_s23   ;;  %s1087_s23 = sphi %s1139_s23, %s26_s23   ;;  %s1083_s22 = sphi %s1137_s22, %s1496_s22   ;;  %s1079_s21 = sphi %s1135_s21, %s1495_s21   ;;  %s1075_s20 = sphi %s1133_s20, %s1494_s20   ;;  %s1071_s19 = sphi %s1131_s19, %s1493_s19   ;;  %s1067_s18 = sphi %s1129_s18, %s1492_s18  }
   0xa   : > { %p60_p0 = scmp.ne.s32.totalorder %s1071_s19, %s1067_s18  ;;  %p1163_p1 = scmp.eq.s32.totalorder %s773_s24, 0 }
   0xb   : > { %p1167_p2 = scmp.eq.s32.totalorder %s773_s24, 1  ;;  %p162_p3 = scmp.eq.s32.totalorder %s774_s25, 1 }
   0xc   : > { %s1477_s26 = scalar_select %p1163_p1, 1, 0 }
   0xd   : > { %s1478_s27 = scalar_select %p1167_p2, 1, 0 }
   0xe   : > { %p1173_p4 = por %p1163_p1, %p60_p0  ;;  %p775_p5 = scmp.ge.s32.totalorder %s1087_s23, 1 }
   0xf   : > { %p1178_p6 = por %p162_p3, %p60_p0  ;;  %p197_p7 = scmp.lt.s32.totalorder %s1087_s23, 3 }
  0x10   : > { %s1479_s28 = scalar_select %p1173_p4, 1, 0 }
  0x11   : > { %s1480_s29 = scalar_select %p1178_p6, 1, 0 }
  0x12   : > { %p1183_p8 = pnand %p775_p5, %p197_p7  ;;  %s1089_s6 = smov [#allocation5]  }
  0x13   : > { %s209_s7 = sshll.u32 %s1089_s6, 4  ;;  %s38_s9 = sadd.s32 1, %s1083_s22  ;;  %s210_s7 = int_to_ptr.vmem [resolvable:$true] %s209_s7 }
  0x14   : > { %s1481_s30 = scalar_select %p1183_p8, 1, 0 }
  0x15   : > { %p814_p9 = pneg %p1183_p8  ;;  %s911_s12 = scalar_lea.hbm %s1469_s2, 192 }
  0x16   : > { %p912_p12 = scmp.ne.s32.totalorder %s1469_s2, %s911_s12  ;;  %p918_p5 = scmp.lt.u32.totalorder %s911_s12, %s1469_s2 }
  0x17   : > { %p1192_p11 = pnand %p814_p9, %p1163_p1 }
  0x19   : > { %p913_p13 = pneg %p1192_p11 }
  0x1b   : > { %p914_p0 = pnand %p913_p13, %p912_p12 }
  0x1d   : > { %p915_p3 = pneg %p914_p0 }
  0x1f   : > { %p920_p7 = pnand %p918_p5, %p915_p3 }
  0x21   : > { %923 = shalt.err (!%p920_p7)
}
  0x22   : > { %s924_s17 = scalar_lea.vmem %s210_s7, 192  ;;  %p932_p1 = scmp.lt.s32.totalorder %s210_s7, %s210_s7 }
  0x23   : > { %p925_p9 = scmp.ne.s32.totalorder %s210_s7, %s924_s17  ;;  %p933_p4 = scmp.lt.s32.totalorder %s924_s17, %s924_s17 }
  0x25   : > { %p927_p10 = pnand %p925_p9, %p913_p13  ;;  %p934_p8 = por %p933_p4, %p932_p1 }
  0x27   : > { %p928_p6 = pneg %p927_p10 }
  0x29   : > { %p935_p2 = pnand %p934_p8, %p928_p6 }
  0x2b   : > { %938 = shalt.err (!%p935_p2)
}
  0x2c   : > { %s1090_s24 = smov 64   ;;  %s1091_s25 = smov 4  }
  0x2d   : > { %817 = dma.hbm_to_vmem [thread:$0]  (!%p1192_p11), %s1469_s2, 192, %s210_s7, [#allocation6], %s1090_s24, %s1090_s24, %s1091_s25  }
  0x2e   : > { %p40_p1 = scmp.ge.s32.totalorder %s38_s9, 2  ;;  %s47_s11 = sadd.s32 1, %s1075_s20 }
  0x2f   : > { %p54_p2 = scmp.ne.s32.totalorder %s1075_s20, %s1071_s19  ;;  %p55_p4 = scmp.eq.s32.totalorder %s1087_s23, 0 }
  0x30   : > { %s1498_s9 = smov (%p40_p1, %s38_s9), 0  ;;  %p1484_p8 = scmp.ne.s32.totalorder %s1478_s27, 0 }
  0x31   : > { %p1219_p6 = por %p55_p4, %p54_p2  ;;  %s42_s8 = ssub.s32 %s1083_s22, %s1498_s9 }
  0x32   : > { %p1225_p10 = por %p1484_p8, %p54_p2  ;;  %p830_p12 = scmp.lt.s32.totalorder %s1087_s23, 2 }
  0x33   : > { %p45_p11 = scmp.eq.s32.totalorder %s42_s8, 0  ;;  %s226_s7 = sand.u32 1, %s1075_s20  }
  0x34   : > { %s778_s14 = sshll.u32 %s226_s7, 3  ;;  %s800_s16 = sshll.u32 %s1083_s22, 7 }
  0x35   : > { %s1234_s15 = scalar_select %p45_p11, %s1075_s20, %s47_s11  }
  0x36   : > { %s1240_s25 = scalar_lea.hbm %s1467_s0, %s800_s16  ;;  %s230_s27 = scalar_lea.vmem [#allocation2], %s778_s14 }
  0x37   : > { %s240_s6 = sshll.u32 %s230_s27, 4  ;;  %p1246_p13 = pnand %p830_p12, %p1219_p6  ;;  %s1242_s6 = int_to_ptr.vmem [resolvable:$true] %s240_s6 }
  0x38   : > { %s227_s11 = scalar_lea.sflag [#allocation3], %s226_s7  ;;  %s939_s8 = scalar_lea.hbm %s1240_s25, 128 }
  0x39   : > { %p940_p0 = scmp.ne.s32.totalorder %s1240_s25, %s939_s8  ;;  %p941_p3 = pneg %p1246_p13 }
  0x3a   : > { %s944_s17 = scalar_lea.hbm %s1467_s0, 256  ;;  %p945_p9 = scmp.lt.u32.totalorder %s1240_s25, %s1467_s0 }
  0x3b   : > { %p942_p5 = pnand %p941_p3, %p940_p0  ;;  %p946_p1 = scmp.lt.u32.totalorder %s944_s17, %s939_s8 }
  0x3c   : > { %p948_p4 = scmp.lt.u32.totalorder %s939_s8, %s1240_s25 }
  0x3d   : > { %p943_p7 = pneg %p942_p5  ;;  %p947_p2 = por %p946_p1, %p945_p9 }
  0x3f   : > { %p949_p6 = por %p948_p4, %p947_p2 }
  0x41   : > { %p950_p8 = pnand %p949_p6, %p943_p7 }
  0x43   : > { %953 = shalt.err (!%p950_p8)
}
  0x44   : > { %s954_s7 = scalar_lea.vmem %s1242_s6, 128  ;;  %s1092_s27 = smov [#allocation2]  }
  0x45   : > { %p955_p12 = scmp.ne.s32.totalorder %s1242_s6, %s954_s7  ;;  %s959_s14 = sshll.u32 %s1092_s27, 4  ;;  %s960_s14 = int_to_ptr.vmem [resolvable:$false] %s959_s14 }
  0x46   : > { %s961_s16 = scalar_lea.vmem %s960_s14, 256  ;;  %p962_p5 = scmp.lt.s32.totalorder %s1242_s6, %s960_s14 }
  0x47   : > { %p957_p11 = pnand %p955_p12, %p941_p3  ;;  %p963_p9 = scmp.lt.s32.totalorder %s961_s16, %s954_s7 }
  0x49   : > { %p958_p0 = pneg %p957_p11  ;;  %p964_p1 = por %p963_p9, %p962_p5 }
  0x4b   : > { %p965_p2 = pnand %p964_p1, %p958_p0 }
  0x4d   : > { %968 = shalt.err (!%p965_p2)
}
  0x4e   : > { %821 = dma.hbm_to_vmem [thread:$0]  (!%p1246_p13), %s1240_s25, 128, %s1242_s6, %s227_s11  }
  0x4f   : > { %p1487_p7 = scmp.ne.s32.totalorder %s1481_s30, 0 }
  0x50   : > { %s1278_s8 = sand.u32 (!%p1487_p7), 1, %s1071_s19   ;;  %p1488_p3 = scmp.ne.s32.totalorder (!%p1487_p7), %s1479_s28, 0 }
  0x51   : > { %262 = sbr.rel (%p1487_p7) target bundleno = 309 (0x135), region = 36  ;;  %s1281_s17 = sshll.u32 (!%p1487_p7), %s1278_s8, 3 }
  0x52   : > { %s265_s12 = scalar_lea.sflag (!%p1487_p7), [#allocation3], %s1278_s8  ;;  %s268_s24 = scalar_lea.vmem (!%p1487_p7), [#allocation2], %s1281_s17 }
  0x58   : > { %1050 = dma.done.wait (%p1488_p3), %s265_s12, 128  }
  0x59   : > { %1052 = vsyncadd (%p1488_p3), %s265_s12, 4294967168  ;;  %p1489_p13 = scmp.ne.s32.totalorder %s1477_s26, 0 }
  0x5b   : > { %1054 = dma.done.wait (%p1489_p13), [#allocation6], 192  }
  0x5c   : > { %1056 = vsyncadd (%p1489_p13), [#allocation6], 4294967104  ;;  %v1093_v0 = vmov 2   ;;  %v1094_v1 = vmov 0   ;;  %v328_v2 = vld [vmem:[#allocation5] sm:$0xf]  ;;  %v335_v10 = vlaneseq }
  0x5d   : > { %890 = vset.pattern.permute.xlu1 %v1093_v0  ;;  %888 = vset.pattern.permute.xlu0 %v1094_v1  ;;  %v1095_v3 = vmov 3   ;;  %v1096_v4 = vmov 1   ;;  %v433_v5 = vld [vmem:[%s1470_s3] sm:$0xf]  ;;  %v447_v6 = vld [vmem:[#allocation5 + $0x4] sm:$0xf] }
  0x5e   : > { %382 = vperm.xlu1 %890, %v328_v2   ;;  %331 = vperm.xlu0 %888, %v328_v2   ;;  %v533_v7 = vld [vmem:[#allocation5 + $0x8] sm:$0xf]  ;;  %v788_v8 = vld [vmem:[%s1470_s3 + $0x4] sm:$0xf]  ;;  %v791_v9 = vld [vmem:[%s1470_s3 + $0x8] sm:$0xf] }
  0x5f   : > { %v336_v11 = vshrl.u32 %v335_v10, 7  ;;  %v326_v16 = vld [vmem:[%s268_s24] sm:$0xff]  ;;  %p315_p4 = scmp.lt.s32.totalorder %s1079_s21, 1  ;;  %s802_s12 = sshll.u32 %s1079_s21, 7 }
  0x60   : > { %s305_s24 = scalar_lea.vmem [#allocation7], %s1281_s17  ;;  %s1376_s25 = scalar_lea.hbm %s1471_s4, %s802_s12 }
  0x61   : > { %v1302_v12 = vsub.s32 0, %v336_v11  ;;  %v341_v13 = vsub.s32 4, %v336_v11  ;;  %v1304_v14 = vsub.s32 1, %v336_v11  ;;  %v365_v15 = vsub.s32 5, %v336_v11  ;;  %s316_s11 = scalar_select %p315_p4, %s1079_s21, 1 }
  0x62   : > { %891 = vset.pattern.permute.xlu1 %v1095_v3  ;;  %889 = vset.pattern.permute.xlu0 %v1096_v4  ;;  %v1309_v17 = vsub.s32 2, %v336_v11  ;;  %v391_v18 = vsub.s32 6, %v336_v11  ;;  %v1311_v19 = vsub.s32 3, %v336_v11  ;;  %v417_v20 = vsub.s32 7, %v336_v11  ;;  %s610_s28 = sshll.u32 %s305_s24, 4  ;;  %s589_s6 = scalar_lea.sflag [#allocation4], %s1278_s8  ;;  %s1378_s28 = int_to_ptr.vmem [resolvable:$true] %s610_s28 }
  0x63   : > { %408 = vperm.xlu1 %891, %v328_v2   ;;  %356 = vperm.xlu0 %889, %v328_v2   ;;  %v338_v21 = vrot.slane %v326_v16, %v1302_v12  ;;  %v342_v22 = vrot.slane %v326_v16, %v341_v13  ;;  %v362_v23 = vrot.slane %v326_v16, %v1304_v14  ;;  %s801_s7 = sshll.u32 %s316_s11, 3  ;;  %s969_s10 = scalar_lea.vmem %s1378_s28, 128 }
  0x64   : > { %v366_v24 = vrot.slane %v326_v16, %v365_v15  ;;  %v388_v27 = vrot.slane %v326_v16, %v1309_v17  ;;  %v392_v28 = vrot.slane %v326_v16, %v391_v18  ;;  %v414_v29 = vrot.slane %v326_v16, %v1311_v19  ;;  %s322_s16 = scalar_lea.vmem %s1468_s1, %s801_s7  ;;  %p970_p6 = scmp.ne.s32.totalorder %s1378_s28, %s969_s10 }
  0x65   : > { %v418_v30 = vrot.slane %v326_v16, %v417_v20  ;;  %v1319_v31 = vrot.slane %v338_v21, %v1302_v12  ;;  %v1322_v32 = vrot.slane %v342_v22, %v1302_v12  ;;  %v1325_v33 = vrot.slane %v362_v23, %v1304_v14  ;;  %v1351_v49 = vld [vmem:[%s322_s16] sm:$0xff]  ;;  %s1097_s11 = smov [#allocation7]  }
  0x66   : > { %v1328_v34 = vrot.slane %v366_v24, %v1304_v14  ;;  %v1331_v35 = vrot.slane %v388_v27, %v1309_v17  ;;  %v1334_v36 = vrot.slane %v392_v28, %v1309_v17  ;;  %v1337_v39 = vrot.slane %v414_v29, %v1311_v19  ;;  %p971_p8 = pnand %p970_p6, %p1225_p10  ;;  %s973_s7 = sshll.u32 %s1097_s11, 4  ;;  %s974_s7 = int_to_ptr.vmem [resolvable:$false] %s973_s7 }
  0x67   : > { %892 = vset.pattern.permute.xlu1 %v1094_v1  ;;  %893 = vset.pattern.permute.xlu0 %v1094_v1  ;;  %v1340_v40 = vrot.slane %v418_v30, %v1311_v19  ;;  %v1357_v57 = vcombine.high %v1351_v49, %v1351_v49  ;;  %s975_s27 = scalar_lea.vmem %s974_s7, 256  ;;  %p976_p11 = scmp.lt.s32.totalorder %s1378_s28, %s974_s7 }
  0x68   : > { %436 = vperm.xlu1 %892, %v433_v5   ;;  %450 = vperm.xlu0 %893, %v447_v6   ;;  %p972_p12 = pneg %p971_p8  ;;  %p977_p0 = scmp.lt.s32.totalorder %s975_s27, %s969_s10 }
  0x6a   : > { %p978_p5 = por %p977_p0, %p976_p11 }
  0x6c   : > { %894 = vset.pattern.permute.xlu1 %v1096_v4  ;;  %896 = vset.pattern.permute.xlu0 %v1095_v3  ;;  %p979_p9 = pnand %p978_p5, %p972_p12 }
  0x6d   : > { %464 = vperm.xlu1 %894, %v447_v6   ;;  %496 = vperm.xlu0 %896, %v447_v6  }
  0x71   : > { %895 = vset.pattern.permute.xlu1 %v1093_v0  ;;  %898 = vset.pattern.permute.xlu0 %v1096_v4 }
  0x72   : > { %480 = vperm.xlu1 %895, %v447_v6   ;;  %542 = vperm.xlu0 %898, %v533_v7  }
  0x76   : > { %897 = vset.pattern.permute.xlu1 %v1094_v1  ;;  %901 = vset.pattern.permute.xlu0 %v1094_v1 }
  0x77   : > { %515 = vperm.xlu1 %897, %v788_v8   ;;  %569 = vperm.xlu0 %901, %v791_v9  }
  0x7b   : > { %536 = vperm.xlu1 %897, %v533_v7  }
  0x7f   : > { %899 = vset.pattern.permute.xlu1 %v1093_v0 }
  0x80   : > { %550 = vperm.xlu1 %899, %v533_v7  }
  0x84   : > { %900 = vset.pattern.permute.xlu1 %v1095_v3 }
  0x85   : > { %558 = vperm.xlu1 %900, %v533_v7  }
  0xdd   : > { %v332_v25 = vpop.permute.xlu0 %331  ;;  %v383_v26 = vpop.permute.xlu1 %382 }
  0xde   : > { %v353_v41 = vmul.f32 %v1319_v31, %v332_v25  ;;  %v354_v42 = vmul.f32 %v1322_v32, %v332_v25  ;;  %v403_v45 = vmul.f32 %v1331_v35, %v383_v26  ;;  %v404_v46 = vmul.f32 %v1334_v36, %v383_v26 }
  0xe2   : > { %v357_v37 = vpop.permute.xlu0 %356  ;;  %v409_v38 = vpop.permute.xlu1 %408 }
  0xe3   : > { %v377_v43 = vmul.f32 %v1325_v33, %v357_v37  ;;  %v378_v44 = vmul.f32 %v1328_v34, %v357_v37  ;;  %v429_v50 = vmul.f32 %v1337_v39, %v409_v38  ;;  %v430_v51 = vmul.f32 %v1340_v40, %v409_v38 }
  0xe5   : > { %v379_v47 = vadd.f32 %v377_v43, %v353_v41  ;;  %v380_v48 = vadd.f32 %v378_v44, %v354_v42 }
  0xe7   : > { %v437_v52 = vpop.permute.xlu1 %436  ;;  %v405_v53 = vadd.f32 %v403_v45, %v379_v47  ;;  %v406_v54 = vadd.f32 %v404_v46, %v380_v48  ;;  %v451_v60 = vpop.permute.xlu0 %450 }
  0xe9   : > { %v431_v55 = vadd.f32 %v429_v50, %v405_v53  ;;  %v432_v56 = vadd.f32 %v430_v51, %v406_v54 }
  0xeb   : > { %v439_v58 = vadd.f32 %v437_v52, %v431_v55  ;;  %v440_v59 = vadd.f32 %v437_v52, %v432_v56 }
  0xec   : > { %v465_v61 = vpop.permute.xlu1 %464 }
  0xed   : > { %v444_v62 = vadd.f32 %v439_v58, %v1351_v49  ;;  %v445_v63 = vadd.f32 %v1357_v57, %v440_v59 }
  0xef   : > { %v456_v0 = vrot.slane %v444_v62, %v1302_v12  ;;  %v460_v1 = vrot.slane %v445_v63, %v1302_v12  ;;  %v470_v2 = vrot.slane %v444_v62, %v1304_v14  ;;  %v474_v3 = vrot.slane %v445_v63, %v1304_v14  ;;  %v497_v12 = vpop.permute.xlu0 %496 }
  0xf0   : > { %v502_v4 = vrot.slane %v444_v62, %v1311_v19  ;;  %v506_v5 = vrot.slane %v445_v63, %v1311_v19  ;;  %v486_v6 = vrot.slane %v444_v62, %v1309_v17  ;;  %v490_v7 = vrot.slane %v445_v63, %v1309_v17 }
  0xf1   : > { %v461_v8 = vmul.f32 %v456_v0, %v451_v60  ;;  %v462_v9 = vmul.f32 %v460_v1, %v451_v60  ;;  %v475_v10 = vmul.f32 %v470_v2, %v465_v61  ;;  %v476_v11 = vmul.f32 %v474_v3, %v465_v61  ;;  %v481_v13 = vpop.permute.xlu1 %480 }
  0xf2   : > { %v491_v14 = vmul.f32 %v486_v6, %v481_v13  ;;  %v492_v15 = vmul.f32 %v490_v7, %v481_v13  ;;  %v576_v19 = vcombine.low %v444_v62, %v445_v63  ;;  %v507_v17 = vmul.f32 %v502_v4, %v497_v12 }
  0xf3   : > { %v477_v16 = vadd.f32 %v475_v10, %v461_v8  ;;  %v478_v18 = vadd.f32 %v476_v11, %v462_v9  ;;  %v508_v20 = vmul.f32 %v506_v5, %v497_v12 }
  0xf4   : > { %578 = vst [vmem:[%s305_s24] sm:$0xff] %v576_v19 }
  0xf5   : > { %v493_v21 = vadd.f32 %v491_v14, %v477_v16  ;;  %v494_v22 = vadd.f32 %v492_v15, %v478_v18 }
  0xf6   : > { %v516_v23 = vpop.permute.xlu1 %515 }
  0xf7   : > { %v509_v24 = vadd.f32 %v507_v17, %v493_v21  ;;  %v510_v25 = vadd.f32 %v508_v20, %v494_v22 }
  0xf8   : > { %982 = shalt.err (!%p979_p9)
}
  0xf9   : > { %s983_s14 = scalar_lea.hbm %s1376_s25, 128  ;;  %s987_s30 = scalar_lea.hbm %s1471_s4, 256 }
  0xfa   : > { %p984_p1 = scmp.ne.s32.totalorder %s1376_s25, %s983_s14  ;;  %p988_p3 = scmp.lt.u32.totalorder %s1376_s25, %s1471_s4 }
  0xfb   : > { %p989_p13 = scmp.lt.u32.totalorder %s987_s30, %s983_s14  ;;  %p991_p6 = scmp.lt.u32.totalorder %s983_s14, %s1376_s25 }
  0xfc   : > { %p985_p2 = pnand %p984_p1, %p1225_p10 }
  0xfd   : > { %p990_p4 = por %p989_p13, %p988_p3 }
  0xfe   : > { %p986_p7 = pneg %p985_p2 }
  0xff   : > { %p992_p8 = por %p991_p6, %p990_p4 }
 0x101   : > { %p993_p12 = pnand %p992_p8, %p986_p7 }
 0x103   : > { %996 = shalt.err (!%p993_p12)
}
 0x104   : > { %810 = dma.vmem_to_hbm [thread:$0]  (%p1225_p10), %s1378_s28, 128, %s1376_s25, %s589_s6   ;;  %v518_v26 = vadd.f32 %v516_v23, %v509_v24  ;;  %v519_v27 = vadd.f32 %v516_v23, %v510_v25  ;;  %v537_v30 = vpop.permute.xlu1 %536  ;;  %v543_v38 = vpop.permute.xlu0 %542 }
 0x105   : > { %v539_v42 = vmul.f32 %v537_v30, %v1319_v31  ;;  %v545_v43 = vmul.f32 %v543_v38, %v1325_v33  ;;  %v540_v46 = vmul.f32 %v537_v30, %v1322_v32  ;;  %v546_v47 = vmul.f32 %v543_v38, %v1328_v34  ;;  %s312_s28 = scalar_lea.vmem [#allocation8], %s1281_s17  ;;  %s1418_s7 = scalar_lea.hbm %s1472_s5, %s802_s12 }
 0x106   : > { %v789_v28 = vmul.f32 -1.442695, %v518_v26  ;;  %v790_v29 = vmul.f32 -1.442695, %v519_v27  ;;  %s626_s25 = sshll.u32 %s312_s28, 4  ;;  %s594_s27 = scalar_lea.sflag [#allocation9], %s1278_s8  ;;  %s1420_s25 = int_to_ptr.vmem [resolvable:$true] %s626_s25 }
 0x107   : > { %v547_v53 = vadd.f32 %v545_v43, %v539_v42  ;;  %v548_v54 = vadd.f32 %v546_v47, %v540_v46  ;;  %s997_s14 = scalar_lea.vmem %s1420_s25, 128  ;;  %s1098_s17 = smov [#allocation8]  }
 0x108   : > { %903 = vpow2.f32 %v789_v28  ;;  %v551_v37 = vpop.permute.xlu1 %550  ;;  %v570_v34 = vpop.permute.xlu0 %569  ;;  %p998_p11 = scmp.ne.s32.totalorder %s1420_s25, %s997_s14  ;;  %s1001_s16 = sshll.u32 %s1098_s17, 4  ;;  %s1002_s16 = int_to_ptr.vmem [resolvable:$false] %s1001_s16 }
 0x109   : > { %905 = vpow2.f32 %v790_v29  ;;  %v553_v51 = vmul.f32 %v551_v37, %v1331_v35  ;;  %v554_v52 = vmul.f32 %v551_v37, %v1334_v36  ;;  %s1003_s21 = scalar_lea.vmem %s1002_s16, 256  ;;  %p1004_p9 = scmp.lt.s32.totalorder %s1420_s25, %s1002_s16 }
 0x10a   : > { %p999_p0 = pnand %p998_p11, %p1225_p10  ;;  %p1005_p1 = scmp.lt.s32.totalorder %s1003_s21, %s997_s14 }
 0x10b   : > { %v555_v55 = vadd.f32 %v553_v51, %v547_v53  ;;  %v556_v32 = vadd.f32 %v554_v52, %v548_v54 }
 0x10c   : > { %v559_v48 = vpop.permute.xlu1 %558  ;;  %p1000_p5 = pneg %p999_p0  ;;  %p1006_p2 = por %p1005_p1, %p1004_p9 }
 0x10d   : > { %v561_v31 = vmul.f32 %v559_v48, %v1337_v39  ;;  %v562_v33 = vmul.f32 %v559_v48, %v1340_v40 }
 0x10e   : > { %p1007_p7 = pnand %p1006_p2, %p1000_p5 }
 0x10f   : > { %v563_v56 = vadd.f32 %v561_v31, %v555_v55  ;;  %v564_v58 = vadd.f32 %v562_v33, %v556_v32 }
 0x111   : > { %v572_v59 = vadd.f32 %v570_v34, %v563_v56  ;;  %v573_v60 = vadd.f32 %v570_v34, %v564_v58 }
 0x112   : > { %v904_v41 = vpop.eup %903 }
 0x113   : > { %v906_v44 = vpop.eup %905  ;;  %v526_v45 = vadd.f32 1.0, %v904_v41 }
 0x114   : > { %v527_v50 = vadd.f32 1.0, %v906_v44 }
 0x115   : > { %907 = vrcp.f32 %v526_v45 }
 0x116   : > { %909 = vrcp.f32 %v527_v50 }
 0x11f   : > { %v908_v35 = vpop.eup %907 }
 0x120   : > { %v910_v36 = vpop.eup %909  ;;  %v579_v61 = vmul.f32 %v908_v35, %v572_v59 }
 0x121   : > { %v580_v62 = vmul.f32 %v910_v36, %v573_v60 }
 0x122   : > { %v581_v63 = vadd.f32 %v579_v61, %v1351_v49 }
 0x123   : > { %v582_v39 = vadd.f32 %v580_v62, %v1357_v57 }
 0x125   : > { %v585_v40 = vcombine.low %v581_v63, %v582_v39 }
 0x127   : > { %587 = vst [vmem:[%s312_s28] sm:$0xff] %v585_v40 }
 0x128   : > { %1010 = shalt.err (!%p1007_p7)
}
 0x129   : > { %s1011_s8 = scalar_lea.hbm %s1418_s7, 128  ;;  %s1015_s30 = scalar_lea.hbm %s1472_s5, 256 }
 0x12a   : > { %p1012_p3 = scmp.ne.s32.totalorder %s1418_s7, %s1011_s8  ;;  %p1016_p6 = scmp.lt.u32.totalorder %s1418_s7, %s1472_s5 }
 0x12b   : > { %p1017_p8 = scmp.lt.u32.totalorder %s1015_s30, %s1011_s8  ;;  %p1019_p11 = scmp.lt.u32.totalorder %s1011_s8, %s1418_s7 }
 0x12c   : > { %p1013_p13 = pnand %p1012_p3, %p1225_p10 }
 0x12d   : > { %p1018_p12 = por %p1017_p8, %p1016_p6 }
 0x12e   : > { %p1014_p4 = pneg %p1013_p13 }
 0x12f   : > { %p1020_p0 = por %p1019_p11, %p1018_p12 }
 0x131   : > { %p1021_p5 = pnand %p1020_p0, %p1014_p4 }
 0x133   : > { %1024 = shalt.err (!%p1021_p5)
}
 0x134   : > { %811 = dma.vmem_to_hbm [thread:$0]  (%p1225_p10), %s1420_s25, 128, %s1418_s7, %s594_s27  }
 0x135 PF: > { %s638_s28 = sand.u32 1, %s1067_s18   ;;  %p1490_p9 = scmp.ne.s32.totalorder %s1480_s29, 0 }
 0x136   : > { %p1491_p1 = scmp.ge.s32.totalorder %s1087_s23, 2  ;;  %s639_s6 = scalar_lea.sflag [#allocation4], %s638_s28 }
 0x138   : > { %p823_p2 = pnand %p1491_p1, %p1490_p9 }
 0x13a   : > { %1058 = dma.done.wait (!%p823_p2), %s639_s6, 128  }
 0x13b   : > { %1060 = vsyncadd (!%p823_p2), %s639_s6, 4294967168  ;;  %s648_s10 = scalar_lea.sflag [#allocation9], %s638_s28 }
 0x13c   : > { %1062 = dma.done.wait (!%p823_p2), %s648_s10, 128  }
 0x13d   : > { %1064 = vsyncadd (!%p823_p2), %s648_s10, 4294967168  ;;  %s26_s23 = sadd.s32 1, %s1087_s23   ;;  %s1492_s18 = smov %s1071_s19 }
 0x13e   : > { %p23_p7 = scmp.ge.s32.totalorder %s26_s23, 4   ;;  %s1493_s19 = smov %s1075_s20 }
 0x13f   : > { %s1494_s20 = smov %s1234_s15  ;;  %s1495_s21 = smov %s1083_s22 }
 0x140   : > { %s1496_s22 = smov %s1498_s9  ;;  %25 = sbr.rel (!%p23_p7) target bundleno = 9 (0x9), region = 109 }
 0x147   :  { %653 = vsyncpa [#allocation3], 1 }
 0x148   :  { %655 = vsyncpa [#allocation3 + $0x1], 1 }
 0x149   :  { %656 = vsyncpa [#allocation6], 1 }
 0x14a   :  { %657 = vsyncpa [#allocation4], 1 }
 0x14b   :  { %659 = vsyncpa [#allocation4 + $0x1], 1 }
 0x14c   :  { %660 = vsyncpa [#allocation9], 1 }
 0x14d   :  { %662 = vsyncpa [#allocation9 + $0x1], 1 }

</bundles_post_ra>
